<compile_context>
chip_gen: v7x
topology: tpu7x:2x2x1
jax: 0.10.0
libtpu: 0.0.40
codegen_flags: <defaults>
</compile_context>

<pallas_src>
import jax
import jax.numpy as jnp
from jax.experimental import pallas as pl
from jax.experimental.pallas import tpu as pltpu


# ---------------------------------------------------------------------------
# Kernel: one fused MLP step for a [TB, *] batch tile.
# ---------------------------------------------------------------------------
def _predictor_kernel(xs_ref, xo_ref, xa_ref,          # activations (batch tile)
                      w1s_ref, w1o_ref, w1a_ref, b1_ref,  # fc1, split along K
                      wh_ref, bh_ref,                   # fused heads [Hp, OP]
                      out_ref):                         # [TB, OP] lane-dense
    # fc1: accumulate the three K-slabs (equivalent to concat(x) @ W1), f32 acc.
    h = jnp.dot(xs_ref[...], w1s_ref[...], preferred_element_type=jnp.float32)
    h = h + jnp.dot(xo_ref[...], w1o_ref[...], preferred_element_type=jnp.float32)
    h = h + jnp.dot(xa_ref[...], w1a_ref[...], preferred_element_type=jnp.float32)
    h = jnp.maximum(h + b1_ref[...], 0.0)               # bias + ReLU (VPU)

    # fused heads: [state | r | zero-pad] in one lane-dense matmul + store.
    y = jnp.dot(h, wh_ref[...], preferred_element_type=jnp.float32) + bh_ref[...]
    out_ref[...] = y.astype(out_ref.dtype)


# ---------------------------------------------------------------------------
# One-time weight packing: pad hidden dim to 128, fuse the two heads, split W1.
# ---------------------------------------------------------------------------
def pack_params(params, dims):
    """dims = (d_self, d_oth, d_act). Returns kernel-ready padded weights."""
    d1, d2, d3 = dims
    w1, b1 = params["w1"], params["b1"]            # [D_in, H], [1, H]
    ws, bs = params["ws"], params["bs"]            # [H, O],    [1, O]
    wr, br = params["wr"], params["br"]            # [H, 1],    [1, 1]
    H = w1.shape[1]
    O = ws.shape[1]

    Hp = ((H + 127) // 128) * 128                  # hidden padded to lane multiple
    OP = ((O + 1 + 127) // 128) * 128              # fused-head width, lane multiple

    w1p = jnp.pad(w1, ((0, 0), (0, Hp - H)))       # zero columns -> h pad cols = 0
    b1p = jnp.pad(b1, ((0, 0), (0, Hp - H)))

    # split fc1 along K to match the three (un-concatenated) inputs
    w1s = w1p[:d1]
    w1o = w1p[d1:d1 + d2]
    w1a = w1p[d1 + d2:]

    # fuse heads: columns [0:O] = state, column O = r, rest zero
    wh = jnp.concatenate([ws, wr], axis=1)         # [H, O+1]
    wh = jnp.pad(wh, ((0, Hp - H), (0, OP - (O + 1))))
    bh = jnp.concatenate([bs, br], axis=1)         # [1, O+1]
    bh = jnp.pad(bh, ((0, 0), (0, OP - (O + 1))))

    # Note: on v6e/v7x, casting w1*/wh to bfloat16 here halves weight traffic
    # at full MXU rate (f32 accumulation is preserved in the kernel).
    return {"w1s": w1s, "w1o": w1o, "w1a": w1a, "b1": b1p,
            "wh": wh, "bh": bh, "H": H, "O": O}


# ---------------------------------------------------------------------------
# Wrapper: batch-tiled pallas_call.
# ---------------------------------------------------------------------------
def predictor_forward(self_tokens, oth_tokens, action_embedding, packed, tb=128):
    B = self_tokens.shape[0]
    d1 = self_tokens.shape[1]
    d2 = oth_tokens.shape[1]
    d3 = action_embedding.shape[1]
    Hp = packed["w1s"].shape[1]
    OP = packed["wh"].shape[1]
    O = packed["O"]
    dtype = self_tokens.dtype

    # Batch tile: >=8 (sublane), default 128 (raise to 256+ on v6e/v7x if the
    # VMEM budget allows; v7x has 64 MiB physical VMEM).
    TB = tb
    if B < TB:
        TB = ((B + 7) // 8) * 8
    Bp = pl.cdiv(B, TB) * TB
    pad_b = Bp - B
    if pad_b:
        self_tokens = jnp.pad(self_tokens, ((0, pad_b), (0, 0)))
        oth_tokens = jnp.pad(oth_tokens, ((0, pad_b), (0, 0)))
        action_embedding = jnp.pad(action_embedding, ((0, pad_b), (0, 0)))

    grid = (Bp // TB,)

    def x_spec(d):
        return pl.BlockSpec((TB, d), lambda i: (i, 0))       # streamed per tile

    def w_spec(shape):
        return pl.BlockSpec(shape, lambda i: (0, 0))          # VMEM-resident

    D_in = d1 + d2 + d3
    flops = 2 * Bp * D_in * Hp + 2 * Bp * Hp * OP
    bytes_accessed = 4 * (Bp * D_in + Bp * OP + D_in * Hp + Hp + Hp * OP + OP)

    out = pl.pallas_call(
        _predictor_kernel,
        out_shape=jax.ShapeDtypeStruct((Bp, OP), dtype),
        grid=grid,
        in_specs=[
            x_spec(d1), x_spec(d2), x_spec(d3),
            w_spec((d1, Hp)), w_spec((d2, Hp)), w_spec((d3, Hp)),
            w_spec((1, Hp)),
            w_spec((Hp, OP)), w_spec((1, OP)),
        ],
        out_specs=pl.BlockSpec((TB, OP), lambda i: (i, 0)),
        compiler_params=pltpu.CompilerParams(
            dimension_semantics=("parallel",),
            vmem_limit_bytes=64 << 20,
        ),
        cost_estimate=pl.CostEstimate(
            flops=flops, transcendentals=0, bytes_accessed=bytes_accessed),
    )(self_tokens, oth_tokens, action_embedding,
      packed["w1s"], packed["w1o"], packed["w1a"], packed["b1"],
      packed["wh"], packed["bh"])

    state = out[:B, :O]
    r = out[:B, O:O + 1]
    return state, r


# ---------------------------------------------------------------------------
# Parameter init (PyTorch nn.Linear-style uniform bound 1/sqrt(fan_in)).
# ---------------------------------------------------------------------------
def init_params(key, input_shape, output_dim, hidden_dim, dtype=jnp.float32):
    k1, k2, k3, k4, k5, k6 = jax.random.split(key, 6)

    def lin(kw, kb, fan_in, fan_out):
        bound = 1.0 / jnp.sqrt(fan_in)
        w = jax.random.uniform(kw, (fan_in, fan_out), dtype, -bound, bound)
        b = jax.random.uniform(kb, (1, fan_out), dtype, -bound, bound)
        return w, b

    w1, b1 = lin(k1, k2, input_shape, hidden_dim)
    ws, bs = lin(k3, k4, hidden_dim, output_dim)
    wr, br = lin(k5, k6, hidden_dim, 1)
    return {"w1": w1, "b1": b1, "ws": ws, "bs": bs, "wr": wr, "br": br}


def reference_forward(self_tokens, oth_tokens, action_embedding, params):
    obs = jnp.concatenate([self_tokens, oth_tokens, action_embedding], axis=1)
    h = jnp.maximum(obs @ params["w1"] + params["b1"], 0.0)
    return h @ params["ws"] + params["bs"], h @ params["wr"] + params["br"]


if __name__ == "__main__":
    # shapes implied by the forward:
    #   self_tokens:      [batch, tokens_dim]
    #   oth_tokens:       [batch, tokens_dim * (nums - 1)]
    #   action_embedding: [batch, action_e_dim]
    batch, tokens_dim, nums, action_e_dim = 2, 8, 3, 8
    d_self = tokens_dim
    d_oth = tokens_dim * (nums - 1)
    d_act = action_e_dim
    input_shape = d_self + d_oth + d_act              # 32
    hidden_dim, output_dim = 32, 16

    key = jax.random.PRNGKey(0)
    kp, ka, kb, kc = jax.random.split(key, 4)
    params = init_params(kp, input_shape, output_dim, hidden_dim)
    packed = pack_params(params, (d_self, d_oth, d_act))

    self_tokens = jax.random.normal(ka, (batch, d_self), jnp.float32)
    oth_tokens = jax.random.normal(kb, (batch, d_oth), jnp.float32)
    action_embedding = jax.random.normal(kc, (batch, d_act), jnp.float32)

    state, r = predictor_forward(self_tokens, oth_tokens, action_embedding, packed)
    jax.block_until_ready((state, r))

    state_ref, r_ref = reference_forward(self_tokens, oth_tokens,
                                         action_embedding, params)
    assert state.shape == (batch, output_dim) and r.shape == (batch, 1)
    assert jnp.allclose(state, state_ref, atol=1e-4, rtol=1e-4)
    assert jnp.allclose(r, r_ref, atol=1e-4, rtol=1e-4)

    print("KERNEL_OK")
</pallas_src>

<mosaic_0001>
module attributes {stable_mosaic.version = 11 : i64} {
  func.func @_predictor_kernel(%arg0: i32, %arg1: memref<8x8xf32, #tpu.memory_space<vmem>>, %arg2: memref<8x16xf32, #tpu.memory_space<vmem>>, %arg3: memref<8x8xf32, #tpu.memory_space<vmem>>, %arg4: memref<8x128xf32, #tpu.memory_space<vmem>>, %arg5: memref<16x128xf32, #tpu.memory_space<vmem>>, %arg6: memref<8x128xf32, #tpu.memory_space<vmem>>, %arg7: memref<1x128xf32, #tpu.memory_space<vmem>>, %arg8: memref<128x128xf32, #tpu.memory_space<vmem>>, %arg9: memref<1x128xf32, #tpu.memory_space<vmem>>, %arg10: memref<8x128xf32, #tpu.memory_space<vmem>>) attributes {dimension_semantics = [#tpu.dimension_semantics<parallel>], iteration_bounds = array<i64: 1>, scalar_prefetch = 0 : i64, scratch_operands = 0 : i64, tpu.core_type = #tpu.core_type<tc>, window_params = [{transform_indices = @transform_0, window_bounds = array<i64: 8, 8>}, {transform_indices = @transform_1, window_bounds = array<i64: 8, 16>}, {transform_indices = @transform_2, window_bounds = array<i64: 8, 8>}, {pipeline_mode = #tpu.pipeline_mode<synchronous>, transform_indices = @transform_3, window_bounds = array<i64: 8, 128>}, {pipeline_mode = #tpu.pipeline_mode<synchronous>, transform_indices = @transform_4, window_bounds = array<i64: 16, 128>}, {pipeline_mode = #tpu.pipeline_mode<synchronous>, transform_indices = @transform_5, window_bounds = array<i64: 8, 128>}, {pipeline_mode = #tpu.pipeline_mode<synchronous>, transform_indices = @transform_6, window_bounds = array<i64: 1, 128>}, {pipeline_mode = #tpu.pipeline_mode<synchronous>, transform_indices = @transform_7, window_bounds = array<i64: 128, 128>}, {pipeline_mode = #tpu.pipeline_mode<synchronous>, transform_indices = @transform_8, window_bounds = array<i64: 1, 128>}, {transform_indices = @transform_9, window_bounds = array<i64: 8, 128>}]} {
    %c0 = arith.constant 0 : index
    %c0_0 = arith.constant 0 : index
    %0 = vector.load %arg1[%c0, %c0_0] : memref<8x8xf32, #tpu.memory_space<vmem>>, vector<8x8xf32>
    %c0_1 = arith.constant 0 : index
    %c0_2 = arith.constant 0 : index
    %1 = vector.load %arg4[%c0_1, %c0_2] : memref<8x128xf32, #tpu.memory_space<vmem>>, vector<8x128xf32>
    %cst = arith.constant dense<0.000000e+00> : vector<8x128xf32>
    %2 = tpu.matmul %0, %1, %cst {dimension_numbers = #tpu.dot_dimension_numbers<[1], [0], [0], [1], [0, 0, 1, 1], [], []>} : vector<8x8xf32>, vector<8x128xf32>, vector<8x128xf32> -> vector<8x128xf32>
    %c0_3 = arith.constant 0 : index
    %c0_4 = arith.constant 0 : index
    %3 = vector.load %arg2[%c0_3, %c0_4] : memref<8x16xf32, #tpu.memory_space<vmem>>, vector<8x16xf32>
    %c0_5 = arith.constant 0 : index
    %c0_6 = arith.constant 0 : index
    %4 = vector.load %arg5[%c0_5, %c0_6] : memref<16x128xf32, #tpu.memory_space<vmem>>, vector<16x128xf32>
    %cst_7 = arith.constant dense<0.000000e+00> : vector<8x128xf32>
    %5 = tpu.matmul %3, %4, %cst_7 {dimension_numbers = #tpu.dot_dimension_numbers<[1], [0], [0], [1], [0, 0, 1, 1], [], []>} : vector<8x16xf32>, vector<16x128xf32>, vector<8x128xf32> -> vector<8x128xf32>
    %6 = arith.addf %2, %5 : vector<8x128xf32>
    %c0_8 = arith.constant 0 : index
    %c0_9 = arith.constant 0 : index
    %7 = vector.load %arg3[%c0_8, %c0_9] : memref<8x8xf32, #tpu.memory_space<vmem>>, vector<8x8xf32>
    %c0_10 = arith.constant 0 : index
    %c0_11 = arith.constant 0 : index
    %8 = vector.load %arg6[%c0_10, %c0_11] : memref<8x128xf32, #tpu.memory_space<vmem>>, vector<8x128xf32>
    %cst_12 = arith.constant dense<0.000000e+00> : vector<8x128xf32>
    %9 = tpu.matmul %7, %8, %cst_12 {dimension_numbers = #tpu.dot_dimension_numbers<[1], [0], [0], [1], [0, 0, 1, 1], [], []>} : vector<8x8xf32>, vector<8x128xf32>, vector<8x128xf32> -> vector<8x128xf32>
    %10 = arith.addf %6, %9 : vector<8x128xf32>
    %c0_13 = arith.constant 0 : index
    %c0_14 = arith.constant 0 : index
    %11 = vector.load %arg7[%c0_13, %c0_14] : memref<1x128xf32, #tpu.memory_space<vmem>>, vector<1x128xf32>
    %12 = vector.broadcast %11 : vector<1x128xf32> to vector<8x128xf32>
    %13 = arith.addf %10, %12 : vector<8x128xf32>
    %cst_15 = arith.constant 0.000000e+00 : f32
    %14 = vector.broadcast %cst_15 : f32 to vector<8x128xf32>
    %15 = arith.maximumf %13, %14 : vector<8x128xf32>
    %c0_16 = arith.constant 0 : index
    %c0_17 = arith.constant 0 : index
    %16 = vector.load %arg8[%c0_16, %c0_17] : memref<128x128xf32, #tpu.memory_space<vmem>>, vector<128x128xf32>
    %cst_18 = arith.constant dense<0.000000e+00> : vector<8x128xf32>
    %17 = tpu.matmul %15, %16, %cst_18 {dimension_numbers = #tpu.dot_dimension_numbers<[1], [0], [0], [1], [0, 0, 1, 1], [], []>} : vector<8x128xf32>, vector<128x128xf32>, vector<8x128xf32> -> vector<8x128xf32>
    %c0_19 = arith.constant 0 : index
    %c0_20 = arith.constant 0 : index
    %18 = vector.load %arg9[%c0_19, %c0_20] : memref<1x128xf32, #tpu.memory_space<vmem>>, vector<1x128xf32>
    %19 = vector.broadcast %18 : vector<1x128xf32> to vector<8x128xf32>
    %20 = arith.addf %17, %19 : vector<8x128xf32>
    %c0_21 = arith.constant 0 : index
    %c0_22 = arith.constant 0 : index
    %21 = vector.load %arg10[%c0_21, %c0_22] : memref<8x128xf32, #tpu.memory_space<vmem>>, vector<8x128xf32>
    tpu.vector_store %arg10[%c0_21, %c0_22], %20 {strides = array<i32>} : memref<8x128xf32, #tpu.memory_space<vmem>>, vector<8x128xf32>,
    return
  }
  func.func @transform_0(%arg0: i32) -> (i32, i32) {
    %c0_i32 = arith.constant 0 : i32
    %c0_i32_0 = arith.constant 0 : i32
    return %arg0, %c0_i32 : i32, i32
  }
  func.func @transform_1(%arg0: i32) -> (i32, i32) {
    %c0_i32 = arith.constant 0 : i32
    %c0_i32_0 = arith.constant 0 : i32
    return %arg0, %c0_i32 : i32, i32
  }
  func.func @transform_2(%arg0: i32) -> (i32, i32) {
    %c0_i32 = arith.constant 0 : i32
    %c0_i32_0 = arith.constant 0 : i32
    return %arg0, %c0_i32 : i32, i32
  }
  func.func @transform_3(%arg0: i32) -> (i32, i32) {
    %c0_i32 = arith.constant 0 : i32
    %c0_i32_0 = arith.constant 0 : i32
    %c0_i32_1 = arith.constant 0 : i32
    return %c0_i32, %c0_i32_0 : i32, i32
  }
  func.func @transform_4(%arg0: i32) -> (i32, i32) {
    %c0_i32 = arith.constant 0 : i32
    %c0_i32_0 = arith.constant 0 : i32
    %c0_i32_1 = arith.constant 0 : i32
    return %c0_i32, %c0_i32_0 : i32, i32
  }
  func.func @transform_5(%arg0: i32) -> (i32, i32) {
    %c0_i32 = arith.constant 0 : i32
    %c0_i32_0 = arith.constant 0 : i32
    %c0_i32_1 = arith.constant 0 : i32
    return %c0_i32, %c0_i32_0 : i32, i32
  }
  func.func @transform_6(%arg0: i32) -> (i32, i32) {
    %c0_i32 = arith.constant 0 : i32
    %c0_i32_0 = arith.constant 0 : i32
    %c0_i32_1 = arith.constant 0 : i32
    return %c0_i32, %c0_i32_0 : i32, i32
  }
  func.func @transform_7(%arg0: i32) -> (i32, i32) {
    %c0_i32 = arith.constant 0 : i32
    %c0_i32_0 = arith.constant 0 : i32
    %c0_i32_1 = arith.constant 0 : i32
    return %c0_i32, %c0_i32_0 : i32, i32
  }
  func.func @transform_8(%arg0: i32) -> (i32, i32) {
    %c0_i32 = arith.constant 0 : i32
    %c0_i32_0 = arith.constant 0 : i32
    %c0_i32_1 = arith.constant 0 : i32
    return %c0_i32, %c0_i32_0 : i32, i32
  }
  func.func @transform_9(%arg0: i32) -> (i32, i32) {
    %c0_i32 = arith.constant 0 : i32
    %c0_i32_0 = arith.constant 0 : i32
    return %arg0, %c0_i32 : i32, i32
  }
}

</mosaic_0001>

<bundles_post_ra>
// kernel: tpu_custom_call.1
= control target key start
LH: loop header
LB: loop body
LE: loop exit
PB: predicated region body
PF: predicated region fallthrough
CT: control target
= control target key end

     0   :  { %14 = vsyncpa [#allocation3], 0  ;;  %s1042_s0 = inlined_call_operand.hbm [shape: f32[8,8], index: 0, kind: input, shape index: {}]   ;;  %s1043_s1 = inlined_call_operand.hbm [shape: f32[8,16], index: 1, kind: input, shape index: {}]   ;;  %s1044_s2 = inlined_call_operand.hbm [shape: f32[8,8], index: 2, kind: input, shape index: {}]   ;;  %s1045_s3 = inlined_call_operand.hbm [shape: f32[8,128], index: 3, kind: input, shape index: {}]   ;;  %s1046_s4 = inlined_call_operand.hbm [shape: f32[16,128], index: 4, kind: input, shape index: {}]   ;;  %s1047_s5 = inlined_call_operand.hbm [shape: f32[8,128], index: 5, kind: input, shape index: {}]   ;;  %s1048_s6 = inlined_call_operand.hbm [shape: f32[1,128], index: 6, kind: input, shape index: {}]   ;;  %s1049_s7 = inlined_call_operand.hbm [shape: f32[128,128], index: 7, kind: input, shape index: {}]   ;;  %s1050_s8 = inlined_call_operand.hbm [shape: f32[1,128], index: 8, kind: input, shape index: {}]   ;;  %s1051_s9 = inlined_call_operand.hbm [shape: f32[8,128], index: 9, kind: output, shape index: {}]  }
   0x1   :  { %15 = vsyncpa [#allocation6], 0 }
   0x2   :  { %16 = vsyncpa [#allocation9], 0 }
   0x3   :  { %17 = vsyncpa [#allocation12], 0 }
   0x4   :  { %18 = vsyncpa [#allocation15], 0 }
   0x5   :  { %19 = vsyncpa [#allocation4], 0  ;;  %s847_s30 = smov [#allocation5]   ;;  %s848_s11 = smov [#allocation8]  }
   0x6   :  { %s36_s10 = sshll.u32 %s847_s30, 4  ;;  %s56_s12 = sshll.u32 %s848_s11, 4  ;;  %s37_s10 = int_to_ptr.vmem [resolvable:$true] %s36_s10  ;;  %s57_s12 = int_to_ptr.vmem [resolvable:$true] %s56_s12 }
   0x7   :  { %s615_s15 = scalar_lea.hbm %s1043_s1, 128 }
   0x8   :  { %p616_p0 = scmp.ne.s32.totalorder %s1043_s1, %s615_s15  ;;  %p619_p1 = scmp.lt.u32.totalorder %s615_s15, %s1043_s1 }
   0xa   :  { %p621_p2 = pnand %p619_p1, %p616_p0 }
   0xc   :  { %624 = shalt.err (!%p621_p2)
}
   0xd   :  { %s625_s20 = scalar_lea.vmem %s37_s10, 128  ;;  %p630_p4 = scmp.lt.s32.totalorder %s37_s10, %s37_s10 }
   0xe   :  { %p626_p3 = scmp.ne.s32.totalorder %s37_s10, %s625_s20  ;;  %p631_p5 = scmp.lt.s32.totalorder %s625_s20, %s625_s20 }
  0x10   :  { %p632_p6 = por %p631_p5, %p630_p4 }
  0x12   :  { %p633_p7 = pnand %p632_p6, %p626_p3 }
  0x14   :  { %636 = shalt.err (!%p633_p7)
}
  0x15   :  { %39 = dma.hbm_to_vmem [thread:$0]  %s1043_s1, 128, %s37_s10, [#allocation6]  }
  0x16   :  { %s637_s25 = scalar_lea.hbm %s1045_s3, 128 }
  0x17   :  { %p638_p8 = scmp.ne.s32.totalorder %s1045_s3, %s637_s25  ;;  %p641_p9 = scmp.lt.u32.totalorder %s637_s25, %s1045_s3 }
  0x19   :  { %p643_p10 = pnand %p641_p9, %p638_p8 }
  0x1b   :  { %646 = shalt.err (!%p643_p10)
}
  0x1c   :  { %s647_s30 = scalar_lea.vmem %s57_s12, 128  ;;  %p652_p12 = scmp.lt.s32.totalorder %s57_s12, %s57_s12 }
  0x1d   :  { %p648_p11 = scmp.ne.s32.totalorder %s57_s12, %s647_s30  ;;  %p653_p13 = scmp.lt.s32.totalorder %s647_s30, %s647_s30 }
  0x1f   :  { %p654_p0 = por %p653_p13, %p652_p12 }
  0x21   :  { %p655_p1 = pnand %p654_p0, %p648_p11 }
  0x23   :  { %658 = shalt.err (!%p655_p1)
}
  0x24   :  { %59 = dma.hbm_to_vmem [thread:$0]  %s1045_s3, 128, %s57_s12, [#allocation9]  }
  0x25   :  { %s849_s11 = smov [#allocation11]   ;;  %s659_s16 = scalar_lea.hbm %s1047_s5, 128 }
  0x26   :  { %s78_s13 = sshll.u32 %s849_s11, 4  ;;  %p660_p2 = scmp.ne.s32.totalorder %s1047_s5, %s659_s16  ;;  %s79_s13 = int_to_ptr.vmem [resolvable:$true] %s78_s13 }
  0x27   :  { %p663_p3 = scmp.lt.u32.totalorder %s659_s16, %s1047_s5 }
  0x29   :  { %p665_p4 = pnand %p663_p3, %p660_p2 }
  0x2b   :  { %668 = shalt.err (!%p665_p4)
}
  0x2c   :  { %s669_s21 = scalar_lea.vmem %s79_s13, 128  ;;  %p674_p6 = scmp.lt.s32.totalorder %s79_s13, %s79_s13 }
  0x2d   :  { %p670_p5 = scmp.ne.s32.totalorder %s79_s13, %s669_s21  ;;  %p675_p7 = scmp.lt.s32.totalorder %s669_s21, %s669_s21 }
  0x2f   :  { %p676_p8 = por %p675_p7, %p674_p6 }
  0x31   :  { %p677_p9 = pnand %p676_p8, %p670_p5 }
  0x33   :  { %680 = shalt.err (!%p677_p9)
}
  0x34   :  { %81 = dma.hbm_to_vmem [thread:$0]  %s1047_s5, 128, %s79_s13, [#allocation12]  }
  0x35   :  { %s850_s22 = smov [#allocation14]   ;;  %s851_s24 = smov [#allocation2]  }
  0x36   :  { %s97_s23 = sshll.u32 %s850_s22, 4  ;;  %s26_s25 = sshll.u32 %s851_s24, 4  ;;  %s98_s23 = int_to_ptr.vmem [resolvable:$true] %s97_s23  ;;  %s27_s25 = int_to_ptr.vmem [resolvable:$true] %s26_s25 }
  0x37   :  { %s681_s28 = scalar_lea.hbm %s1049_s7, 2048 }
  0x38   :  { %p682_p10 = scmp.ne.s32.totalorder %s1049_s7, %s681_s28  ;;  %p685_p11 = scmp.lt.u32.totalorder %s681_s28, %s1049_s7 }
  0x3a   :  { %p687_p12 = pnand %p685_p11, %p682_p10 }
  0x3c   :  { %690 = shalt.err (!%p687_p12)
}
  0x3d   :  { %s691_s5 = scalar_lea.vmem %s98_s23, 2048  ;;  %p696_p0 = scmp.lt.s32.totalorder %s98_s23, %s98_s23 }
  0x3e   :  { %p692_p13 = scmp.ne.s32.totalorder %s98_s23, %s691_s5  ;;  %p697_p1 = scmp.lt.s32.totalorder %s691_s5, %s691_s5 }
  0x40   :  { %p698_p2 = por %p697_p1, %p696_p0 }
  0x42   :  { %p699_p3 = pnand %p698_p2, %p692_p13 }
  0x44   :  { %702 = shalt.err (!%p699_p3)
}
  0x45   :  { %s852_s11 = smov 128   ;;  %s853_s13 = smov 8  }
  0x46   :  { %103 = dma.hbm_to_vmem [thread:$0]  %s1049_s7, 2048, %s98_s23, [#allocation15], %s852_s11, %s852_s11, %s853_s13  }
  0x47   :  { %s703_s18 = scalar_lea.hbm %s1042_s0, 128 }
  0x48   :  { %p704_p4 = scmp.ne.s32.totalorder %s1042_s0, %s703_s18  ;;  %p707_p5 = scmp.lt.u32.totalorder %s703_s18, %s1042_s0 }
  0x4a   :  { %p709_p6 = pnand %p707_p5, %p704_p4 }
  0x4c   :  { %712 = shalt.err (!%p709_p6)
}
  0x4d   :  { %s713_s12 = scalar_lea.vmem %s27_s25, 128  ;;  %p718_p8 = scmp.lt.s32.totalorder %s27_s25, %s27_s25 }
  0x4e   :  { %p714_p7 = scmp.ne.s32.totalorder %s27_s25, %s713_s12  ;;  %p719_p9 = scmp.lt.s32.totalorder %s713_s12, %s713_s12 }
  0x50   :  { %p720_p10 = por %p719_p9, %p718_p8 }
  0x52   :  { %p721_p11 = pnand %p720_p10, %p714_p7 }
  0x54   :  { %724 = shalt.err (!%p721_p11)
}
  0x55   :  { %29 = dma.hbm_to_vmem [thread:$0]  %s1042_s0, 128, %s27_s25, [#allocation3]  }
  0x56   :  { %s854_s23 = smov [#allocation7]   ;;  %s855_s26 = smov [#allocation10]  }
  0x57   :  { %s46_s24 = sshll.u32 %s854_s23, 4  ;;  %s65_s27 = sshll.u32 %s855_s26, 4  ;;  %s47_s24 = int_to_ptr.vmem [resolvable:$true] %s46_s24  ;;  %s66_s27 = int_to_ptr.vmem [resolvable:$true] %s65_s27 }
  0x58   :  { %s725_s30 = scalar_lea.hbm %s1044_s2, 128 }
  0x59   :  { %p726_p12 = scmp.ne.s32.totalorder %s1044_s2, %s725_s30  ;;  %p729_p13 = scmp.lt.u32.totalorder %s725_s30, %s1044_s2 }
  0x5b   :  { %p731_p0 = pnand %p729_p13, %p726_p12 }
  0x5d   :  { %734 = shalt.err (!%p731_p0)
}
  0x5e   :  { %s735_s0 = scalar_lea.vmem %s47_s24, 128  ;;  %p740_p2 = scmp.lt.s32.totalorder %s47_s24, %s47_s24 }
  0x5f   :  { %p736_p1 = scmp.ne.s32.totalorder %s47_s24, %s735_s0  ;;  %p741_p3 = scmp.lt.s32.totalorder %s735_s0, %s735_s0 }
  0x61   :  { %p742_p4 = por %p741_p3, %p740_p2 }
  0x63   :  { %p743_p5 = pnand %p742_p4, %p736_p1 }
  0x65   :  { %746 = shalt.err (!%p743_p5)
}
  0x66   :  { %49 = dma.hbm_to_vmem [thread:$0]  %s1044_s2, 128, %s47_s24, [#allocation6]  }
  0x67   :  { %s747_s18 = scalar_lea.hbm %s1046_s4, 256 }
  0x68   :  { %p748_p6 = scmp.ne.s32.totalorder %s1046_s4, %s747_s18  ;;  %p751_p7 = scmp.lt.u32.totalorder %s747_s18, %s1046_s4 }
  0x6a   :  { %p753_p8 = pnand %p751_p7, %p748_p6 }
  0x6c   :  { %756 = shalt.err (!%p753_p8)
}
  0x6d   :  { %s757_s12 = scalar_lea.vmem %s66_s27, 256  ;;  %p762_p10 = scmp.lt.s32.totalorder %s66_s27, %s66_s27 }
  0x6e   :  { %p758_p9 = scmp.ne.s32.totalorder %s66_s27, %s757_s12  ;;  %p763_p11 = scmp.lt.s32.totalorder %s757_s12, %s757_s12 }
  0x70   :  { %p764_p12 = por %p763_p11, %p762_p10 }
  0x72   :  { %p765_p13 = pnand %p764_p12, %p758_p9 }
  0x74   :  { %768 = shalt.err (!%p765_p13)
}
  0x75   :  { %71 = dma.hbm_to_vmem [thread:$0]  %s1046_s4, 256, %s66_s27, [#allocation9], %s852_s11, %s852_s11, %s853_s13  }
  0x76   :  { %s856_s22 = smov [#allocation13]   ;;  %s857_s24 = smov [#allocation16]  }
  0x77   :  { %s88_s23 = sshll.u32 %s856_s22, 4  ;;  %s110_s26 = sshll.u32 %s857_s24, 4  ;;  %s89_s23 = int_to_ptr.vmem [resolvable:$true] %s88_s23  ;;  %s111_s26 = int_to_ptr.vmem [resolvable:$true] %s110_s26 }
  0x78   :  { %s769_s30 = scalar_lea.hbm %s1048_s6, 16 }
  0x79   :  { %p770_p0 = scmp.ne.s32.totalorder %s1048_s6, %s769_s30  ;;  %p773_p1 = scmp.lt.u32.totalorder %s769_s30, %s1048_s6 }
  0x7b   :  { %p775_p2 = pnand %p773_p1, %p770_p0 }
  0x7d   :  { %778 = shalt.err (!%p775_p2)
}
  0x7e   :  { %s779_s4 = scalar_lea.vmem %s89_s23, 16  ;;  %s783_s11 = scalar_lea.vmem %s89_s23, 32 }
  0x7f   :  { %p780_p3 = scmp.ne.s32.totalorder %s89_s23, %s779_s4  ;;  %p784_p4 = scmp.lt.s32.totalorder %s89_s23, %s89_s23 }
  0x80   :  { %p785_p5 = scmp.lt.s32.totalorder %s783_s11, %s779_s4 }
  0x82   :  { %p786_p6 = por %p785_p5, %p784_p4 }
  0x84   :  { %p787_p7 = pnand %p786_p6, %p780_p3 }
  0x86   :  { %790 = shalt.err (!%p787_p7)
}
  0x87   :  { %91 = dma.hbm_to_vmem [thread:$0]  %s1048_s6, 16, %s89_s23, [#allocation12]  }
  0x88   :  { %s791_s15 = scalar_lea.hbm %s1050_s8, 16 }
  0x89   :  { %p792_p8 = scmp.ne.s32.totalorder %s1050_s8, %s791_s15  ;;  %p795_p9 = scmp.lt.u32.totalorder %s791_s15, %s1050_s8 }
  0x8b   :  { %p797_p10 = pnand %p795_p9, %p792_p8 }
  0x8d   :  { %800 = shalt.err (!%p797_p10)
}
  0x8e   :  { %s801_s20 = scalar_lea.vmem %s111_s26, 16  ;;  %s805_s21 = scalar_lea.vmem %s111_s26, 32 }
  0x8f   :  { %p802_p11 = scmp.ne.s32.totalorder %s111_s26, %s801_s20  ;;  %p806_p12 = scmp.lt.s32.totalorder %s111_s26, %s111_s26 }
  0x90   :  { %p807_p13 = scmp.lt.s32.totalorder %s805_s21, %s801_s20 }
  0x92   :  { %p808_p0 = por %p807_p13, %p806_p12 }
  0x94   :  { %p809_p1 = pnand %p808_p0, %p802_p11 }
  0x96   :  { %812 = shalt.err (!%p809_p1)
}
  0x97   :  { %113 = dma.hbm_to_vmem [thread:$0]  %s1050_s8, 16, %s111_s26, [#allocation15]  }
  0x98   :  { %835 = dma.done.wait [#allocation3], 128  }
  0x99   :  { %836 = vsyncadd [#allocation3], 4294967168 }
  0x9a   :  { %837 = dma.done.wait [#allocation6], 256  }
  0x9b   :  { %838 = vsyncadd [#allocation6], 4294967040 }
  0x9c   :  { %839 = dma.done.wait [#allocation9], 384  }
  0x9d   :  { %840 = vsyncadd [#allocation9], 4294966912 }
  0x9e   :  { %841 = dma.done.wait [#allocation12], 144  }
  0x9f   :  { %842 = vsyncadd [#allocation12], 4294967152 }
  0xa0   :  { %843 = dma.done.wait [#allocation15], 2064  }
  0xa1   :  { %844 = vsyncadd [#allocation15], 4294965232  ;;  %v858_v0 = vmov 0.0|0.0   ;;  %vm859_vm0 = vmmov 0   ;;  %v860_v1 = vmov 0.0   ;;  %v144_v2 = vld [vmem:[#allocation10] sm:$0xff] }
  0xa2   :  { %573 = vmatprep.subr.bf16.mxu1 %v858_v0  ;;  %525 = vmatprep.mubr.msk.f32.mxu1 %vm859_vm0, %v860_v1  ;;  %v145_v3 = vld [vmem:[#allocation10 + $0x8] sm:$0xff]  ;;  %v379_v5 = vld [vmem:[#allocation14] sm:$0xff]  ;;  %vm146_vm1 = vcmask 130048   ;;  %v382_v10 = vld [vmem:[#allocation14 + $0x18] sm:$0xff]  ;;  %vm220_vm2 = vcmask 64512   ;;  %s861_s8 = smov [#allocation17]  }
  0xa3   :  { %576 = vmatprep.subr.bf16.mxu0 %v858_v0  ;;  %570 = vmatprep.mubr.msk.f32.mxu0 %vm859_vm0, %v860_v1  ;;  %v574_v4 = vpack.c.bf16 %v145_v3, %v144_v2  ;;  %v380_v6 = vld [vmem:[#allocation14 + $0x8] sm:$0xff]  ;;  %v381_v9 = vld [vmem:[#allocation14 + $0x10] sm:$0xff]  ;;  %v142_v11 = vld [vmem:[#allocation8] sm:$0xff]  ;;  %s479_s12 = sshll.u32 %s861_s8, 4  ;;  %s480_s12 = int_to_ptr.vmem [resolvable:$true] %s479_s12 }
  0xa4   :  { %v143_v7 = vld [vmem:[#allocation5] sm:$0xff]  ;;  %v577_v8 = vpack.c.bf16 %v380_v6, %v379_v5  ;;  %v580_v12 = vpack.c.bf16 %v382_v10, %v381_v9  ;;  %v383_v13 = vld [vmem:[#allocation14 + $0x20] sm:$0xff]  ;;  %v295_v16 = vld [vmem:[#allocation11] sm:$0xff]  ;;  %s813_s2 = scalar_lea.vmem %s480_s12, 128  ;;  %p818_p3 = scmp.lt.s32.totalorder %s480_s12, %s480_s12 }
  0xa5   :  { %575 = vmatpush3.bf16.msra.mxu1 %v574_v4  ;;  %v384_v14 = vld [vmem:[#allocation14 + $0x28] sm:$0xff]  ;;  %v385_v18 = vld [vmem:[#allocation14 + $0x30] sm:$0xff]  ;;  %v386_v19 = vld [vmem:[#allocation14 + $0x38] sm:$0xff]  ;;  %p814_p2 = scmp.ne.s32.totalorder %s480_s12, %s813_s2  ;;  %p819_p4 = scmp.lt.s32.totalorder %s813_s2, %s813_s2 }
  0xa6   :  { %528 = vmatprep.subr.mxu1 %v860_v1  ;;  %578 = vmatpush3.bf16.msra.mxu0 %v577_v8  ;;  %v141_v15 = vld [vmem:[#allocation2] sm:$0xff]  ;;  %v583_v17 = vpack.c.bf16 %v384_v14, %v383_v13  ;;  %v294_v20 = vld [vmem:[#allocation7] sm:$0xff]  ;;  %v586_v21 = vpack.c.bf16 %v386_v19, %v385_v18  ;;  %v495_v40 = vld [vmem:[#allocation13] ss:$0 sm:$0xff] }
  0xa7   :  { %579 = vmatprep.subr.bf16.mxu0 %v858_v0  ;;  %v387_v22 = vld [vmem:[#allocation14 + $0x40] sm:$0xff]  ;;  %v388_v23 = vld [vmem:[#allocation14 + $0x48] sm:$0xff]  ;;  %v389_v25 = vld [vmem:[#allocation14 + $0x50] sm:$0xff]  ;;  %p820_p5 = por %p819_p4, %p818_p3 }
  0xa8   :  { %526 = vmatmul.mubr.msk.f32.vlgmr.msra.gmra.mrb[0].mxu1 %vm146_vm1, %v143_v7  ;;  %v589_v24 = vpack.c.bf16 %v388_v23, %v387_v22  ;;  %v390_v26 = vld [vmem:[#allocation14 + $0x58] sm:$0xff]  ;;  %v391_v28 = vld [vmem:[#allocation14 + $0x60] sm:$0xff]  ;;  %v392_v29 = vld [vmem:[#allocation14 + $0x68] sm:$0xff] }
  0xa9   :  { %529 = vmatpush3.msra.mxu1 %v142_v11  ;;  %530 = vmatprep.mubr.msk.f32.mxu1 %vm859_vm0, %v860_v1  ;;  %v592_v27 = vpack.c.bf16 %v390_v26, %v389_v25  ;;  %v595_v30 = vpack.c.bf16 %v392_v29, %v391_v28  ;;  %v393_v31 = vld [vmem:[#allocation14 + $0x70] sm:$0xff]  ;;  %v394_v32 = vld [vmem:[#allocation14 + $0x78] sm:$0xff]  ;;  %v496_v45 = vld [vmem:[#allocation16] ss:$0 sm:$0xff]  ;;  %p821_p6 = pnand %p820_p5, %p814_p2 }
  0xaa   :  { %533 = vmatprep.subr.mxu1 %v860_v1  ;;  %581 = vmatpush3.bf16.msra.mxu0 %v580_v12  ;;  %v598_v33 = vpack.c.bf16 %v394_v32, %v393_v31 }
  0xab   :  { %582 = vmatprep.subr.bf16.mxu0 %v858_v0 }
  0xac   :  { %531 = vmatmul.mubr.msk.f32.vlgmr.msra.gmra.mrb[2].mxu1 %vm220_vm2, %v141_v15 }
  0xad   :  { %534 = vmatpush3.msra.mxu1 %v295_v16  ;;  %535 = vmatprep.mubr.msk.f32.mxu1 %vm859_vm0, %v860_v1 }
  0xae   :  { %584 = vmatpush3.bf16.msra.mxu0 %v583_v17 }
  0xaf   :  { %585 = vmatprep.subr.bf16.mxu0 %v858_v0 }
  0xb0   :  { %536 = vmatmul.mubr.msk.f32.vlgmr.msra.gmra.mrb[4].mxu1 %vm220_vm2, %v294_v20 }
  0xb2   :  { %587 = vmatpush3.bf16.msra.mxu0 %v586_v21 }
  0xb3   :  { %588 = vmatprep.subr.bf16.mxu0 %v858_v0 }
  0xb6   :  { %590 = vmatpush3.bf16.msra.mxu0 %v589_v24 }
  0xb7   :  { %591 = vmatprep.subr.bf16.mxu0 %v858_v0 }
  0xba   :  { %593 = vmatpush3.bf16.msra.mxu0 %v592_v27 }
  0xbb   :  { %594 = vmatprep.subr.bf16.mxu0 %v858_v0 }
  0xbe   :  { %596 = vmatpush3.bf16.msra.mxu0 %v595_v30 }
  0xbf   :  { %597 = vmatprep.subr.bf16.mxu0 %v858_v0 }
  0xc2   :  { %599 = vmatpush3.bf16.msra.mxu0 %v598_v33 }
 0x17b   :  { %v216_v34 = vpop.f32.mrb[0].mxu1 }
 0x17c   :  { %v527_v35 = vpop.f32.mrb[1].mxu1 }
 0x17f   :  { %v290_v36 = vpop.f32.mrb[2].mxu1 }
 0x180   :  { %v291_v37 = vadd.f32 %v290_v36, %v216_v34  ;;  %v532_v38 = vpop.f32.mrb[3].mxu1 }
 0x183   :  { %v365_v39 = vpop.f32.mrb[4].mxu1 }
 0x184   :  { %v369_v41 = vadd.f32 %v365_v39, %v291_v37  ;;  %v537_v42 = vpop.f32.mrb[5].mxu1 }
 0x186   :  { %v377_v43 = vadd.f32 %v495_v40, %v369_v41 }
 0x188   :  { %v378_v44 = vmax.f32 %v377_v43, 0.0 }
 0x18a   :  { %571 = vmatmul.mubr.f32.vlgmr.msra.gmra.mrb[0].mxu0 %v378_v44 }
 0x25d   :  { %v468_v46 = vpop.f32.mrb[0].mxu0 }
 0x25e   :  { %v469_v47 = vadd.f32 %v496_v45, %v468_v46  ;;  %v572_v48 = vpop.f32.mrb[1].mxu0 }
 0x260   :  { %472 = vst [vmem:[#allocation17] sm:$0xff] %v469_v47 }
 0x261   :  { %824 = shalt.err (!%p821_p6)
}
 0x262   :  { %s825_s23 = scalar_lea.hbm %s1051_s9, 128 }
 0x263   :  { %p826_p7 = scmp.ne.s32.totalorder %s1051_s9, %s825_s23  ;;  %p829_p8 = scmp.lt.u32.totalorder %s825_s23, %s1051_s9 }
 0x265   :  { %p831_p9 = pnand %p829_p8, %p826_p7 }
 0x267   :  { %834 = shalt.err (!%p831_p9)
}
 0x268   :  { %482 = dma.vmem_to_hbm [thread:$0]  %s480_s12, 128, %s1051_s9, [#allocation4]  }
 0x269   :  { %845 = dma.done.wait [#allocation4], 128  }
 0x26a   :  { %846 = vsyncadd [#allocation4], 4294967168 }
 0x26b   :  { %486 = vsyncpa [#allocation3], 1 }
 0x26c   :  { %487 = vsyncpa [#allocation6], 1 }
 0x26d   :  { %488 = vsyncpa [#allocation9], 1 }
 0x26e   :  { %489 = vsyncpa [#allocation12], 1 }
 0x26f   :  { %490 = vsyncpa [#allocation15], 1 }
 0x270   :  { %491 = vsyncpa [#allocation4], 1 }

</bundles_post_ra>
